<compile_context>
chip_gen: v7x
topology: tpu7x:2x2x1
jax: 0.10.0
libtpu: 0.0.40
codegen_flags: <defaults>
</compile_context>

<pallas_src>
import functools

import jax
import jax.numpy as jnp
from jax.experimental import pallas as pl
from jax.experimental.pallas import tpu as pltpu

_LANES = 128


def _ema_kernel(cur_ref, last_ref, out_ref, *, mu):
    # Pure VPU elementwise op on the current VMEM tile. mu / (1 - mu) fold to
    # weak-typed constants at trace time, so bf16/f32 inputs keep their dtype.
    out_ref[...] = mu * cur_ref[...] + (1.0 - mu) * last_ref[...]


def ema(current, last_average, *, mu, tile_rows=2048):
    """new_average = mu * current + (1 - mu) * last_average (elementwise).

    `current` / `last_average` may be any shape (e.g. NCHW); `mu` is a static
    Python float (module constant). Pair with jax.jit(donate_argnums=...) on
    `last_average` to get a true in-place update of the running average.
    """
    if last_average is None:
        return current

    assert current.shape == last_average.shape, (current.shape, last_average.shape)
    assert tile_rows % 8 == 0, "tile_rows must be a multiple of 8"
    if last_average.dtype != current.dtype:
        last_average = last_average.astype(current.dtype)

    orig_shape = current.shape
    dtype = current.dtype
    total = current.size

    # Flatten to a lane-dense (rows, 128) slab. Pad only when the flat length
    # is not already a multiple of 128; row-direction raggedness is handled
    # in-kernel (masked partial last block), not by padding to tile size.
    rem = total % _LANES
    if rem != 0:
        pad = _LANES - rem
        cur_flat = jnp.pad(current.reshape(-1), (0, pad))
        last_flat = jnp.pad(last_average.reshape(-1), (0, pad))
    else:
        pad = 0
        cur_flat = current.reshape(-1)
        last_flat = last_average.reshape(-1)

    rows = (total + pad) // _LANES
    cur2d = cur_flat.reshape(rows, _LANES)
    last2d = last_flat.reshape(rows, _LANES)

    # Large blocks amortize per-grid-step overhead; tiny inputs fall back to a
    # single full-extent block (always a legal block shape).
    block_rows = tile_rows if rows >= tile_rows else rows
    grid = (pl.cdiv(rows, block_rows),)
    spec = pl.BlockSpec((block_rows, _LANES), lambda i: (i, 0))

    out2d = pl.pallas_call(
        functools.partial(_ema_kernel, mu=float(mu)),
        out_shape=jax.ShapeDtypeStruct((rows, _LANES), dtype),
        grid=grid,
        in_specs=[spec, spec],
        out_specs=spec,
        # EMA semantically overwrites the running average: write the new
        # average over `last_average`'s buffer.
        input_output_aliases={1: 0},
        compiler_params=pltpu.CompilerParams(
            # Parallel grid axis -> shardable across the 2 TensorCores on v7x.
            dimension_semantics=("parallel",),
        ),
    )(cur2d, last2d)

    out_flat = out2d.reshape(-1)
    if pad != 0:
        out_flat = out_flat[:total]
    return out_flat.reshape(orig_shape)


if __name__ == "__main__":
    key = jax.random.PRNGKey(0)
    k1, k2 = jax.random.split(key)

    mu = 0.9
    x_shape = (2, 4, 16, 16)  # NCHW

    current = jax.random.normal(k1, x_shape, dtype=jnp.float32)
    last_average = jax.random.normal(k2, x_shape, dtype=jnp.float32)
    current_bf16 = current.astype(jnp.bfloat16)
    last_bf16 = last_average.astype(jnp.bfloat16)

    # Compute references BEFORE the kernel calls: last_average / last_bf16 are
    # donated (in-place EMA update) below.
    ref_f32 = mu * current + (1.0 - mu) * last_average
    ref_bf16 = mu * current_bf16 + (1.0 - mu) * last_bf16

    # last_average is None -> identity (handled in wrapper, no kernel needed).
    out_none = ema(current, None, mu=mu)
    assert out_none.shape == x_shape

    # Standard usage: donate the running-average buffer so the aliased output
    # truly updates it in place.
    ema_fn = jax.jit(functools.partial(ema, mu=mu), donate_argnums=(1,))

    out = jax.block_until_ready(ema_fn(current, last_average))
    assert out.shape == ref_f32.shape and out.dtype == ref_f32.dtype
    assert jnp.allclose(out, ref_f32, atol=1e-6, rtol=1e-6)

    # bf16 path (HBM-bound kernel -> half the bytes, half the wall-clock).
    out_bf16 = jax.block_until_ready(ema_fn(current_bf16, last_bf16))
    assert out_bf16.shape == x_shape and out_bf16.dtype == jnp.bfloat16
    assert jnp.allclose(out_bf16.astype(jnp.float32),
                        ref_bf16.astype(jnp.float32), atol=1e-2, rtol=1e-2)

    print("KERNEL_OK")
</pallas_src>

<mosaic_0001>
module attributes {stable_mosaic.version = 11 : i64} {
  func.func @_ema_kernel(%arg0: i32, %arg1: memref<16x128xf32, #tpu.memory_space<vmem>>, %arg2: memref<16x128xf32, #tpu.memory_space<vmem>>, %arg3: memref<16x128xf32, #tpu.memory_space<vmem>>) attributes {dimension_semantics = [#tpu.dimension_semantics<parallel>], iteration_bounds = array<i64: 1>, scalar_prefetch = 0 : i64, scratch_operands = 0 : i64, tpu.core_type = #tpu.core_type<tc>, window_params = [{transform_indices = @transform_0, window_bounds = array<i64: 16, 128>}, {transform_indices = @transform_1, window_bounds = array<i64: 16, 128>}, {transform_indices = @transform_2, window_bounds = array<i64: 16, 128>}]} {
    %c0 = arith.constant 0 : index
    %c0_0 = arith.constant 0 : index
    %0 = vector.load %arg1[%c0, %c0_0] : memref<16x128xf32, #tpu.memory_space<vmem>>, vector<16x128xf32>
    %cst = arith.constant 0.899999976 : f32
    %1 = vector.broadcast %cst : f32 to vector<16x128xf32>
    %2 = arith.mulf %1, %0 : vector<16x128xf32>
    %c0_1 = arith.constant 0 : index
    %c0_2 = arith.constant 0 : index
    %3 = vector.load %arg2[%c0_1, %c0_2] : memref<16x128xf32, #tpu.memory_space<vmem>>, vector<16x128xf32>
    %cst_3 = arith.constant 1.000000e-01 : f32
    %4 = vector.broadcast %cst_3 : f32 to vector<16x128xf32>
    %5 = arith.mulf %4, %3 : vector<16x128xf32>
    %6 = arith.addf %2, %5 : vector<16x128xf32>
    %c0_4 = arith.constant 0 : index
    %c0_5 = arith.constant 0 : index
    %7 = vector.load %arg3[%c0_4, %c0_5] : memref<16x128xf32, #tpu.memory_space<vmem>>, vector<16x128xf32>
    tpu.vector_store %arg3[%c0_4, %c0_5], %6 {strides = array<i32>} : memref<16x128xf32, #tpu.memory_space<vmem>>, vector<16x128xf32>,
    return
  }
  func.func @transform_0(%arg0: i32) -> (i32, i32) {
    %c0_i32 = arith.constant 0 : i32
    %c0_i32_0 = arith.constant 0 : i32
    return %arg0, %c0_i32 : i32, i32
  }
  func.func @transform_1(%arg0: i32) -> (i32, i32) {
    %c0_i32 = arith.constant 0 : i32
    %c0_i32_0 = arith.constant 0 : i32
    return %arg0, %c0_i32 : i32, i32
  }
  func.func @transform_2(%arg0: i32) -> (i32, i32) {
    %c0_i32 = arith.constant 0 : i32
    %c0_i32_0 = arith.constant 0 : i32
    return %arg0, %c0_i32 : i32, i32
  }
}

</mosaic_0001>

<bundles_post_ra>
// kernel: ema.1
= control target key start
LH: loop header
LB: loop body
LE: loop exit
PB: predicated region body
PF: predicated region fallthrough
CT: control target
= control target key end

     0   :  { %s60_s0 = inlined_call_operand.vmem [shape: f32[16,128], index: 0, kind: input, shape index: {}]   ;;  %s61_s1 = inlined_call_operand.vmem [shape: f32[16,128], index: 1, kind: input, shape index: {}, may-alias: {1,2}]   ;;  %s62_s2 = inlined_call_operand.vmem [shape: f32[16,128], index: 2, kind: output, shape index: {}, may-alias: {1,2}]  }
   0x1   :  { %v11_v0 = vld [vmem:[%s60_s0] sm:$0xff]  ;;  %v12_v2 = vld [vmem:[%s60_s0 + $0x8] sm:$0xff] }
   0x2   :  { %v15_v1 = vld [vmem:[%s61_s1] sm:$0xff]  ;;  %v13_v3 = vmul.f32 0.9, %v11_v0  ;;  %v14_v5 = vmul.f32 0.9, %v12_v2  ;;  %v16_v6 = vld [vmem:[%s61_s1 + $0x8] sm:$0xff] }
   0x3   :  { %v17_v4 = vmul.f32 0.1, %v15_v1  ;;  %v18_v8 = vmul.f32 0.1, %v16_v6 }
   0x5   :  { %v19_v7 = vadd.f32 %v17_v4, %v13_v3  ;;  %v20_v9 = vadd.f32 %v18_v8, %v14_v5 }
   0x7   :  { %21 = vst [vmem:[%s62_s2] sm:$0xff] %v19_v7  ;;  %22 = vst [vmem:[%s62_s2 + $0x8] sm:$0xff] %v20_v9 }

</bundles_post_ra>
